<compile_context>
chip_gen: v7x
topology: tpu7x:2x2x1
jax: 0.10.0
libtpu: 0.0.40
codegen_flags: <defaults>
</compile_context>

<pallas_src>
from functools import partial

import jax
import jax.numpy as jnp
from jax.experimental import pallas as pl
from jax.experimental.pallas import tpu as pltpu

EPS = 1e-5  # PyTorch BatchNorm2d default eps

TM_PREF = 256   # rows of patches per tile
TN_PREF = 256   # output channels per tile


def _round_up(x, m):
    return ((x + m - 1) // m) * m


def _tile(dim, pref, align):
    """Largest tile <= pref that is a multiple of `align` (>= align)."""
    return min(pref, _round_up(max(dim, 1), align))


def _vmem_limit():
    # 3/4 of per-core physical VMEM, capped: ~96 MiB on v5e/v6e (128 MiB phys),
    # 48 MiB on v7x (64 MiB phys).  Falls back to a safe 48 MiB.
    try:
        phys = pltpu.get_tpu_info().vmem_capacity_bytes
        return int(min(phys * 3 // 4, 96 * 1024 * 1024))
    except Exception:
        return 48 * 1024 * 1024


VMEM_LIMIT = _vmem_limit()


# ----------------------------------------------------------------------------
# Pallas kernels
# ----------------------------------------------------------------------------
def _mm_bn_kernel(relu, has_res, *refs):
    """Tiled GEMM (patches @ BN-folded weight) with fused epilogue.

    grid = (M/tm, N/tn, K/tk), K innermost.  Accumulates into an f32 VMEM
    scratch (k==0 overwrites, no separate zero-init pass); the finalize step
    adds the folded BN bias (+ f32 residual), applies ReLU and stores bf16.
    """
    if has_res:
        x_ref, w_ref, b_ref, r_ref, o_ref, acc_ref = refs
    else:
        x_ref, w_ref, b_ref, o_ref, acc_ref = refs
        r_ref = None
    k = pl.program_id(2)

    prod = jnp.dot(x_ref[...], w_ref[...], preferred_element_type=jnp.float32)

    @pl.when(k == 0)
    def _first():
        acc_ref[...] = prod

    @pl.when(k > 0)
    def _accum():
        acc_ref[...] += prod

    @pl.when(k == pl.num_programs(2) - 1)
    def _finalize():
        y = acc_ref[...] + b_ref[...]
        if has_res:
            y = y + r_ref[...].astype(jnp.float32)
        if relu:
            y = jnp.maximum(y, 0.0)
        o_ref[...] = y.astype(o_ref.dtype)


def _conv3x3_s1_kernel(m, wp, x_ref, w_ref, b_ref, o_ref):
    """De-materialized 3x3 stride-1 conv (+ folded BN + ReLU).

    x_ref holds the whole spatially padded image of one batch element,
    flattened to (1, Hp*Wp, Cin).  Because stride == 1, tap (dy, dx) is the
    contiguous row window [dy*Wp + dx, dy*Wp + dx + Ho*Wp) of that flat array
    (static slice, no im2col in HBM); the 9 shifted GEMMs accumulate in f32.
    The Wp-Wo "garbage" columns per output row are sliced off by the wrapper.
    """
    acc = jnp.dot(x_ref[0, pl.ds(0, m), :], w_ref[0],
                  preferred_element_type=jnp.float32)
    for tap in range(1, 9):
        dy, dx = divmod(tap, 3)
        a = x_ref[0, pl.ds(dy * wp + dx, m), :]
        acc = acc + jnp.dot(a, w_ref[tap], preferred_element_type=jnp.float32)
    y = jnp.maximum(acc + b_ref[...], 0.0)
    o_ref[0] = y.astype(o_ref.dtype)


def _max3_kernel(a_ref, b_ref, c_ref, o_ref):
    o_ref[...] = jnp.maximum(jnp.maximum(a_ref[...], b_ref[...]), c_ref[...])


# ----------------------------------------------------------------------------
# JAX glue: im2col (strided convs only), tiling helpers, fused conv wrappers
# ----------------------------------------------------------------------------
def _im2col(x, kh, kw, stride, pad):
    """x: (N, H, W, C) -> patches (N*Ho*Wo, kh*kw*C), tap order (dy, dx, c).

    Only used for 1x1 convs (pure reshape / strided subsample, no duplication)
    and the strided 7x7 / 3x3 convs."""
    # TODO(synk): de-materialize the stride-2 im2col (stem 7x7, 3x3-s2) via
    # element-offset BlockSpecs as well; duplication there is only 2.25x/12x.
    n, h, w, c = x.shape
    xp = jnp.pad(x, ((0, 0), (pad, pad), (pad, pad), (0, 0)))
    ho = (h + 2 * pad - kh) // stride + 1
    wo = (w + 2 * pad - kw) // stride + 1
    cols = []
    for dy in range(kh):
        for dx in range(kw):
            sl = jax.lax.slice(
                xp,
                (0, dy, dx, 0),
                (n, dy + (ho - 1) * stride + 1, dx + (wo - 1) * stride + 1, c),
                (1, stride, stride, 1),
            )
            cols.append(sl)
    patches = jnp.concatenate(cols, axis=-1) if len(cols) > 1 else cols[0]
    return patches.reshape(n * ho * wo, kh * kw * c), (n, ho, wo)


def _pick_tk(k, pref=1024):
    """Pad K only to the next multiple of 128 and use the largest 128-multiple
    tile <= pref that divides the padded K exactly (no over-padding waste)."""
    kp = _round_up(k, 128)
    tk = 128
    c = 256
    while c <= min(kp, pref):
        if kp % c == 0:
            tk = c
        c += 128
    return kp, tk


def _fold_bn(bn):
    scale = bn["gamma"] / jnp.sqrt(bn["var"] + EPS)
    bias = bn["beta"] - bn["mean"] * scale
    return scale, bias


def conv_bn_act(x, w, scale, bias, stride, pad, relu=True, residual=None):
    """Fused Conv2d(bias=False) + folded BatchNorm [+ residual] [+ ReLU] as an
    im2col GEMM.  x: (N, H, W, Cin) NHWC; w: (Cout, Cin, kh, kw) (OIHW).
    Output (and inter-layer activations) are bf16; accumulation is f32."""
    cout, cin, kh, kw = w.shape
    patches, (n, ho, wo) = _im2col(x, kh, kw, stride, pad)

    # Fold BN scale into the weight columns (f32), then cast operands to bf16.
    wmat = jnp.transpose(w, (2, 3, 1, 0)).reshape(kh * kw * cin, cout)
    wmat = wmat * scale[None, :]

    m, k = patches.shape
    kp, tk = _pick_tk(k)
    tm = _tile(m, TM_PREF, 16)
    mp = _round_up(m, tm)
    grid_i = mp // tm
    # If M fits in a single block, widen tn so the patches tile is re-fetched
    # fewer times across the cout axis (wide-channel 1x1 convs).
    tn = _tile(cout, 512 if grid_i == 1 else TN_PREF, 128)
    np_ = _round_up(cout, tn)
    # v7x megacore: keep >= 2 parallel (i, j) blocks so the 2nd TC isn't idle.
    while grid_i * (np_ // tn) < 2 and tn > 128:
        tn //= 2
        np_ = _round_up(cout, tn)
    if grid_i * (np_ // tn) < 2 and tm >= 32:
        tm //= 2
        mp = _round_up(m, tm)
        grid_i = mp // tm

    xpad = jnp.pad(patches, ((0, mp - m), (0, kp - k))).astype(jnp.bfloat16)
    wpad = jnp.pad(wmat, ((0, kp - k), (0, np_ - cout))).astype(jnp.bfloat16)
    bpad = jnp.pad(bias, (0, np_ - cout)).reshape(1, np_).astype(jnp.float32)

    args = [xpad, wpad, bpad]
    in_specs = [
        pl.BlockSpec((tm, tk), lambda i, j, kk: (i, kk)),
        pl.BlockSpec((tk, tn), lambda i, j, kk: (kk, j)),
        pl.BlockSpec((1, tn), lambda i, j, kk: (0, j)),
    ]
    has_res = residual is not None
    if has_res:
        rpad = jnp.pad(residual.reshape(m, cout).astype(jnp.bfloat16),
                       ((0, mp - m), (0, np_ - cout)))
        args.append(rpad)
        in_specs.append(pl.BlockSpec((tm, tn), lambda i, j, kk: (i, j)))

    out = pl.pallas_call(
        partial(_mm_bn_kernel, relu, has_res),
        out_shape=jax.ShapeDtypeStruct((mp, np_), jnp.bfloat16),
        grid=(mp // tm, np_ // tn, kp // tk),
        in_specs=in_specs,
        out_specs=pl.BlockSpec((tm, tn), lambda i, j, kk: (i, j)),
        scratch_shapes=[pltpu.VMEM((tm, tn), jnp.float32)],
        compiler_params=pltpu.CompilerParams(
            dimension_semantics=("parallel", "parallel", "arbitrary"),
            vmem_limit_bytes=VMEM_LIMIT),
    )(*args)

    return out[:m, :cout].reshape(n, ho, wo, cout)


def conv3x3_s1_bn_relu(x, w, scale, bias):
    """3x3 stride-1 pad-1 Conv + folded BN + ReLU without materialized im2col.

    The spatially padded activation (1 top / 2 bottom / 1+1 left-right rows,
    the extra bottom row keeps every tap window in-bounds) is flattened once
    to (N, Hp*Wp, Cin); the 9 taps are sliced statically inside the kernel.
    """
    # TODO(synk): at production spatial sizes, split M over whole output rows
    # (with a 2-row halo) to shrink the per-step VMEM footprint further.
    n, h, w_sp, cin = x.shape
    cout = w.shape[0]
    ho, wo = h, w_sp
    wp = w_sp + 2
    hp = h + 3
    m = ho * wp

    xp = jnp.pad(x, ((0, 0), (1, 2), (1, 1), (0, 0)))
    xflat = xp.reshape(n, hp * wp, cin).astype(jnp.bfloat16)

    wmat = jnp.transpose(w, (2, 3, 1, 0)).reshape(9, cin, cout)
    wmat = wmat * scale[None, None, :]
    tn = _tile(cout, TN_PREF, 128)
    np_ = _round_up(cout, tn)
    wpad = jnp.pad(wmat, ((0, 0), (0, 0), (0, np_ - cout))).astype(jnp.bfloat16)
    bpad = jnp.pad(bias, (0, np_ - cout)).reshape(1, np_).astype(jnp.float32)

    out = pl.pallas_call(
        partial(_conv3x3_s1_kernel, m, wp),
        out_shape=jax.ShapeDtypeStruct((n, m, np_), jnp.bfloat16),
        grid=(n, np_ // tn),
        in_specs=[
            pl.BlockSpec((1, hp * wp, cin), lambda b, j: (b, 0, 0)),
            pl.BlockSpec((9, cin, tn), lambda b, j: (0, 0, j)),
            pl.BlockSpec((1, tn), lambda b, j: (0, j)),
        ],
        out_specs=pl.BlockSpec((1, m, tn), lambda b, j: (b, 0, j)),
        compiler_params=pltpu.CompilerParams(
            dimension_semantics=("parallel", "parallel"),
            vmem_limit_bytes=VMEM_LIMIT),
    )(xflat, wpad, bpad)

    # Drop the garbage columns (x in [Wo, Wp)) and the cout padding.
    return out.reshape(n, ho, wp, np_)[:, :, :wo, :cout]


def maxpool_3x3_s2(x):
    """MaxPool2d(kernel_size=3, stride=2, padding=1) on NHWC input.

    dx reduction (3 W-strided slices) is folded in XLA (~0.75x input
    re-materialized instead of a 9x tap stack); the Pallas kernel does the
    dy reduction on a lane-dense (rows, Wo*C) layout."""
    n, h, w, c = x.shape
    ho = (h + 2 - 3) // 2 + 1
    wo = (w + 2 - 3) // 2 + 1
    xp = jnp.pad(x, ((0, 0), (1, 1), (1, 1), (0, 0)),
                 constant_values=-jnp.inf)
    wmax = None
    for dx in range(3):
        sl = jax.lax.slice(xp, (0, 0, dx, 0),
                           (n, h + 2, dx + (wo - 1) * 2 + 1, c),
                           (1, 1, 2, 1))
        wmax = sl if wmax is None else jnp.maximum(wmax, sl)
    taps = []
    for dy in range(3):
        sl = jax.lax.slice(wmax, (0, dy, 0, 0),
                           (n, dy + (ho - 1) * 2 + 1, wo, c),
                           (1, 2, 1, 1))
        taps.append(sl.reshape(n * ho, wo * c))

    mrows = n * ho
    lane = wo * c
    per_row_bytes = lane * x.dtype.itemsize * 8   # 3 in + 1 out, double-buffered
    tmr = min(512, _round_up(mrows, 8),
              max(8, (16 * 1024 * 1024 // per_row_bytes) // 8 * 8))
    mp = _round_up(mrows, tmr)
    taps = [jnp.pad(t, ((0, mp - mrows), (0, 0))) for t in taps]

    out = pl.pallas_call(
        _max3_kernel,
        out_shape=jax.ShapeDtypeStruct((mp, lane), x.dtype),
        grid=(mp // tmr,),
        in_specs=[pl.BlockSpec((tmr, lane), lambda i: (i, 0))] * 3,
        out_specs=pl.BlockSpec((tmr, lane), lambda i: (i, 0)),
        compiler_params=pltpu.CompilerParams(
            dimension_semantics=("parallel",),
            vmem_limit_bytes=VMEM_LIMIT),
    )(*taps)
    return out[:mrows].reshape(n, ho, wo, c)


# ----------------------------------------------------------------------------
# Parameter construction (deterministic, mirrors ResNetBackbone.__init__)
# ----------------------------------------------------------------------------
class _KeyGen:
    def __init__(self, key):
        self._key = key

    def __call__(self):
        self._key, sub = jax.random.split(self._key)
        return sub


def _make_conv(key, cout, cin, k):
    fan_in = cin * k * k
    return (jax.random.normal(key, (cout, cin, k, k), jnp.float32)
            * (2.0 / fan_in) ** 0.5)


def _make_bn(key, c):
    k1, k2, k3, k4 = jax.random.split(key, 4)
    return dict(
        gamma=1.0 + 0.1 * jax.random.normal(k1, (c,), jnp.float32),
        beta=0.1 * jax.random.normal(k2, (c,), jnp.float32),
        mean=0.1 * jax.random.normal(k3, (c,), jnp.float32),
        var=1.0 + 0.5 * jax.random.uniform(k4, (c,), jnp.float32),
    )


def init_resnet_backbone(key, layers):
    """Same topology as ResNetBackbone(layers, block=Bottleneck)."""
    kg = _KeyGen(key)
    params = {
        "stem": {"w": _make_conv(kg(), 64, 3, 7), "bn": _make_bn(kg(), 64)},
        "layers": [],
    }
    inplanes = 64
    cfgs = [(64, layers[0], 1), (128, layers[1], 2),
            (256, layers[2], 2), (512, layers[3], 2)]
    for planes, blocks, stride in cfgs:
        layer = []
        for bi in range(blocks):
            s = stride if bi == 0 else 1
            blk = {
                "stride": s,
                "w1": _make_conv(kg(), planes, inplanes, 1),
                "bn1": _make_bn(kg(), planes),
                "w2": _make_conv(kg(), planes, planes, 3),
                "bn2": _make_bn(kg(), planes),
                "w3": _make_conv(kg(), planes * 4, planes, 1),
                "bn3": _make_bn(kg(), planes * 4),
            }
            if bi == 0 and (stride != 1 or inplanes != planes * 4):
                blk["wd"] = _make_conv(kg(), planes * 4, inplanes, 1)
                blk["bnd"] = _make_bn(kg(), planes * 4)
            layer.append(blk)
            if bi == 0:
                inplanes = planes * 4
        params["layers"].append(layer)
    return params


# ----------------------------------------------------------------------------
# Forward pass (Pallas) — mirrors ResNetBackbone.forward (partial_bn=False)
# ----------------------------------------------------------------------------
def backbone_forward(x_nchw, params):
    x = jnp.transpose(x_nchw, (0, 2, 3, 1))  # NCHW -> NHWC

    s, b = _fold_bn(params["stem"]["bn"])
    x = conv_bn_act(x, params["stem"]["w"], s, b, stride=2, pad=3, relu=True)
    x = maxpool_3x3_s2(x)

    outs = []
    for layer in params["layers"]:
        for blk in layer:
            identity = x
            s1, b1 = _fold_bn(blk["bn1"])
            out = conv_bn_act(x, blk["w1"], s1, b1, 1, 0, relu=True)
            s2, b2 = _fold_bn(blk["bn2"])
            if blk["stride"] == 1:
                out = conv3x3_s1_bn_relu(out, blk["w2"], s2, b2)
            else:
                out = conv_bn_act(out, blk["w2"], s2, b2, blk["stride"], 1,
                                  relu=True)
            if "wd" in blk:
                sd, bd = _fold_bn(blk["bnd"])
                identity = conv_bn_act(identity, blk["wd"], sd, bd,
                                       blk["stride"], 0, relu=False)
            s3, b3 = _fold_bn(blk["bn3"])
            out = conv_bn_act(out, blk["w3"], s3, b3, 1, 0, relu=True,
                              residual=identity)
            x = out
        outs.append(jnp.transpose(x, (0, 3, 1, 2)).astype(jnp.float32))
    return outs


# ----------------------------------------------------------------------------
# Pure-JAX reference (lax conv / reduce_window) for validation
# ----------------------------------------------------------------------------
def ref_forward(x, params):
    def conv(x_, w, stride, pad):
        return jax.lax.conv_general_dilated(
            x_, w, (stride, stride), ((pad, pad), (pad, pad)),
            dimension_numbers=("NCHW", "OIHW", "NCHW"),
            precision=jax.lax.Precision.HIGHEST)

    def bn(x_, p):
        s = p["gamma"] / jnp.sqrt(p["var"] + EPS)
        b = p["beta"] - p["mean"] * s
        return x_ * s[None, :, None, None] + b[None, :, None, None]

    x = jax.nn.relu(bn(conv(x, params["stem"]["w"], 2, 3), params["stem"]["bn"]))
    x = jax.lax.reduce_window(x, -jnp.inf, jax.lax.max, (1, 1, 3, 3),
                              (1, 1, 2, 2), ((0, 0), (0, 0), (1, 1), (1, 1)))
    outs = []
    for layer in params["layers"]:
        for blk in layer:
            identity = x
            out = jax.nn.relu(bn(conv(x, blk["w1"], 1, 0), blk["bn1"]))
            out = jax.nn.relu(bn(conv(out, blk["w2"], blk["stride"], 1),
                                 blk["bn2"]))
            out = bn(conv(out, blk["w3"], 1, 0), blk["bn3"])
            if "wd" in blk:
                identity = bn(conv(identity, blk["wd"], blk["stride"], 0),
                              blk["bnd"])
            x = jax.nn.relu(out + identity)
        outs.append(x)
    return outs


# ----------------------------------------------------------------------------
if __name__ == "__main__":
    key = jax.random.PRNGKey(0)
    k_in, k_par = jax.random.split(key)

    # Small ResNet: layers=[1, 2, 1, 1] (covers stride-1 and stride-2 conv2
    # paths, downsample and identity blocks).
    layers_cfg = [1, 2, 1, 1]
    params = init_resnet_backbone(k_par, layers_cfg)

    # Input: NCHW, 3 channels (the stem requires 3), small spatial size.
    x = jax.random.normal(k_in, (2, 3, 64, 64), jnp.float32)

    outs = backbone_forward(x, params)
    outs = [jax.block_until_ready(o) for o in outs]

    refs = ref_forward(x, params)
    refs = [jax.block_until_ready(o) for o in refs]

    # bf16 MXU operands + bf16 inter-layer activations (f32 accumulation)
    # vs a Precision.HIGHEST f32 reference: allow ~5% (of max |ref|) error.
    # This is expected rounding accumulation across ~17 stores, not a bug;
    # real bugs show up as O(1)-relative differences.
    for i, (op, orf) in enumerate(zip(outs, refs)):
        assert op.shape == orf.shape, (op.shape, orf.shape)
        diff = float(jnp.max(jnp.abs(op - orf)))
        scale = float(jnp.max(jnp.abs(orf)))
        assert diff <= 5e-2 + 5e-2 * scale, \
            f"layer {i + 1}: max diff {diff} (ref scale {scale})"

    print("KERNEL_OK")
</pallas_src>

<mosaic_0001>
module attributes {stable_mosaic.version = 11 : i64} {
  func.func @_mm_bn_kernel(%arg0: i32, %arg1: i32, %arg2: i32, %arg3: memref<256x256xbf16, #tpu.memory_space<vmem>>, %arg4: memref<256x128xbf16, #tpu.memory_space<vmem>>, %arg5: memref<1x128xf32, #tpu.memory_space<vmem>>, %arg6: memref<256x128xbf16, #tpu.memory_space<vmem>>, %arg7: memref<256x128xf32, #tpu.memory_space<vmem>>) attributes {dimension_semantics = [#tpu.dimension_semantics<parallel>, #tpu.dimension_semantics<parallel>, #tpu.dimension_semantics<arbitrary>], iteration_bounds = array<i64: 8, 1, 1>, scalar_prefetch = 0 : i64, scratch_operands = 1 : i64, tpu.core_type = #tpu.core_type<tc>, window_params = [{transform_indices = @transform_0, window_bounds = array<i64: 256, 256>}, {transform_indices = @transform_1, window_bounds = array<i64: 256, 128>}, {transform_indices = @transform_2, window_bounds = array<i64: 1, 128>}, {transform_indices = @transform_3, window_bounds = array<i64: 256, 128>}]} {
    %c0 = arith.constant 0 : index
    %c0_0 = arith.constant 0 : index
    %0 = vector.load %arg3[%c0, %c0_0] : memref<256x256xbf16, #tpu.memory_space<vmem>>, vector<256x256xbf16>
    %c0_1 = arith.constant 0 : index
    %c0_2 = arith.constant 0 : index
    %1 = vector.load %arg4[%c0_1, %c0_2] : memref<256x128xbf16, #tpu.memory_space<vmem>>, vector<256x128xbf16>
    %cst = arith.constant dense<0.000000e+00> : vector<256x128xf32>
    %2 = tpu.matmul %0, %1, %cst {dimension_numbers = #tpu.dot_dimension_numbers<[1], [0], [0], [1], [0, 0, 1, 1], [], []>} : vector<256x256xbf16>, vector<256x128xbf16>, vector<256x128xf32> -> vector<256x128xf32>
    %c0_i32 = arith.constant 0 : i32
    %3 = arith.cmpi eq, %arg2, %c0_i32 : i32
    %4 = arith.extui %3 : i1 to i32
    %c0_i32_3 = arith.constant 0 : i32
    %5 = arith.cmpi ne, %4, %c0_i32_3 : i32
    scf.if %5 {
      %c0_8 = arith.constant 0 : index
      %c0_9 = arith.constant 0 : index
      %12 = vector.load %arg7[%c0_8, %c0_9] : memref<256x128xf32, #tpu.memory_space<vmem>>, vector<256x128xf32>
      tpu.vector_store %arg7[%c0_8, %c0_9], %2 {strides = array<i32>} : memref<256x128xf32, #tpu.memory_space<vmem>>, vector<256x128xf32>,
    } else {
    }
    %c0_i32_4 = arith.constant 0 : i32
    %6 = arith.cmpi sgt, %arg2, %c0_i32_4 : i32
    %7 = arith.extui %6 : i1 to i32
    %c0_i32_5 = arith.constant 0 : i32
    %8 = arith.cmpi ne, %7, %c0_i32_5 : i32
    scf.if %8 {
      %c0_8 = arith.constant 0 : index
      %c0_9 = arith.constant 0 : index
      %12 = vector.load %arg7[%c0_8, %c0_9] : memref<256x128xf32, #tpu.memory_space<vmem>>, vector<256x128xf32>
      %13 = arith.addf %12, %2 : vector<256x128xf32>
      %c0_10 = arith.constant 0 : index
      %c0_11 = arith.constant 0 : index
      %14 = vector.load %arg7[%c0_10, %c0_11] : memref<256x128xf32, #tpu.memory_space<vmem>>, vector<256x128xf32>
      tpu.vector_store %arg7[%c0_10, %c0_11], %13 {strides = array<i32>} : memref<256x128xf32, #tpu.memory_space<vmem>>, vector<256x128xf32>,
    } else {
    }
    %c0_i32_6 = arith.constant 0 : i32
    %9 = arith.cmpi eq, %arg2, %c0_i32_6 : i32
    %10 = arith.extui %9 : i1 to i32
    %c0_i32_7 = arith.constant 0 : i32
    %11 = arith.cmpi ne, %10, %c0_i32_7 : i32
    scf.if %11 {
      %c0_8 = arith.constant 0 : index
      %c0_9 = arith.constant 0 : index
      %12 = vector.load %arg7[%c0_8, %c0_9] : memref<256x128xf32, #tpu.memory_space<vmem>>, vector<256x128xf32>
      %c0_10 = arith.constant 0 : index
      %c0_11 = arith.constant 0 : index
      %13 = vector.load %arg5[%c0_10, %c0_11] : memref<1x128xf32, #tpu.memory_space<vmem>>, vector<1x128xf32>
      %14 = vector.broadcast %13 : vector<1x128xf32> to vector<256x128xf32>
      %15 = arith.addf %12, %14 : vector<256x128xf32>
      %cst_12 = arith.constant 0.000000e+00 : f32
      %16 = vector.broadcast %cst_12 : f32 to vector<256x128xf32>
      %17 = arith.maximumf %15, %16 : vector<256x128xf32>
      %18 = arith.truncf %17 : vector<256x128xf32> to vector<256x128xbf16>
      %c0_13 = arith.constant 0 : index
      %c0_14 = arith.constant 0 : index
      %19 = vector.load %arg6[%c0_13, %c0_14] : memref<256x128xbf16, #tpu.memory_space<vmem>>, vector<256x128xbf16>
      tpu.vector_store %arg6[%c0_13, %c0_14], %18 {strides = array<i32>} : memref<256x128xbf16, #tpu.memory_space<vmem>>, vector<256x128xbf16>,
    } else {
    }
    return
  }
  func.func @transform_0(%arg0: i32, %arg1: i32, %arg2: i32) -> (i32, i32) {
    %c0_i32 = arith.constant 0 : i32
    return %arg0, %arg2 : i32, i32
  }
  func.func @transform_1(%arg0: i32, %arg1: i32, %arg2: i32) -> (i32, i32) {
    %c0_i32 = arith.constant 0 : i32
    return %arg2, %arg1 : i32, i32
  }
  func.func @transform_2(%arg0: i32, %arg1: i32, %arg2: i32) -> (i32, i32) {
    %c0_i32 = arith.constant 0 : i32
    %c0_i32_0 = arith.constant 0 : i32
    return %c0_i32, %arg1 : i32, i32
  }
  func.func @transform_3(%arg0: i32, %arg1: i32, %arg2: i32) -> (i32, i32) {
    %c0_i32 = arith.constant 0 : i32
    return %arg0, %arg1 : i32, i32
  }
}

</mosaic_0001>

<bundles_post_ra>
// kernel: tpu_custom_call.1
= control target key start
LH: loop header
LB: loop body
LE: loop exit
PB: predicated region body
PF: predicated region fallthrough
CT: control target
= control target key end

     0   :  { %8 = vsyncpa [#allocation4], 0  ;;  %s2257_s0 = inlined_call_operand.hbm [shape: bf16[2048,256], index: 0, kind: input, shape index: {}]   ;;  %s2258_s1 = inlined_call_operand.hbm [shape: bf16[256,128], index: 1, kind: input, shape index: {}]   ;;  %s2259_s2 = inlined_call_operand.vmem [shape: f32[1,128], index: 2, kind: input, shape index: {}]   ;;  %s2260_s3 = inlined_call_operand.hbm [shape: bf16[2048,128], index: 3, kind: output, shape index: {}]  }
   0x1   :  { %10 = vsyncpa [#allocation4 + $0x1], 0 }
   0x2   :  { %11 = vsyncpa [#allocation7], 0 }
   0x3   :  { %12 = vsyncpa [#allocation5], 0 }
   0x4   :  { %14 = vsyncpa [#allocation5 + $0x1], 0  ;;  %s1949_s12 = smov 0   ;;  %s1951_s13 = smov 0  }
   0x5   :  { %s1953_s14 = smov 0   ;;  %s1955_s15 = smov 0  }
   0x6   :  { %s1957_s16 = smov 0   ;;  %s1959_s17 = smov 0  }
   0x7 LB: > { %s1273_s18 = sadd.s32 4294967295, %s1918_s17   ;;  %s1274_s19 = sadd.s32 4294967294, %s1918_s17   ;;  %s1918_s17 = sphi %s1959_s17, %s20_s17   ;;  %s1914_s16 = sphi %s1957_s16, %s2283_s16   ;;  %s1910_s15 = sphi %s1955_s15, %s2282_s15   ;;  %s1906_s14 = sphi %s1953_s14, %s2281_s14   ;;  %s1902_s13 = sphi %s1951_s13, %s2280_s13   ;;  %s1898_s12 = sphi %s1949_s12, %s2279_s12  }
   0x8   : > { %p61_p0 = scmp.ne.s32.totalorder %s1902_s13, %s1898_s12  ;;  %p1983_p1 = scmp.eq.s32.totalorder %s1273_s18, 0 }
   0x9   : > { %p1987_p2 = scmp.eq.s32.totalorder %s1273_s18, 7  ;;  %p147_p3 = scmp.eq.s32.totalorder %s1274_s19, 7 }
   0xa   : > { %s2265_s20 = scalar_select %p1983_p1, 1, 0 }
   0xb   : > { %s2266_s21 = scalar_select %p1987_p2, 1, 0 }
   0xc   : > { %p1993_p4 = por %p1983_p1, %p61_p0  ;;  %p1275_p5 = scmp.ge.s32.totalorder %s1918_s17, 1 }
   0xd   : > { %p1998_p6 = por %p147_p3, %p61_p0  ;;  %p154_p7 = scmp.lt.s32.totalorder %s1918_s17, 9 }
   0xe   : > { %s2267_s22 = scalar_select %p1993_p4, 1, 0 }
   0xf   : > { %s2268_s23 = scalar_select %p1998_p6, 1, 0 }
  0x10   : > { %p2003_p8 = pnand %p1275_p5, %p154_p7  ;;  %s1920_s25 = smov [#allocation6]  }
  0x11   : > { %s170_s26 = sshll.u32 %s1920_s25, 4  ;;  %s39_s28 = sadd.s32 1, %s1914_s16  ;;  %s171_s26 = int_to_ptr.vmem [resolvable:$true] %s170_s26 }
  0x12   : > { %s2269_s24 = scalar_select %p2003_p8, 1, 0 }
  0x13   : > { %p1639_p9 = pneg %p2003_p8  ;;  %s1774_s4 = scalar_lea.hbm %s2258_s1, 2048 }
  0x14   : > { %p1775_p11 = scmp.ne.s32.totalorder %s2258_s1, %s1774_s4  ;;  %p1781_p3 = scmp.lt.u32.totalorder %s1774_s4, %s2258_s1 }
  0x15   : > { %p2011_p10 = pnand %p1639_p9, %p1983_p1 }
  0x17   : > { %p1776_p12 = pneg %p2011_p10 }
  0x19   : > { %p1777_p13 = pnand %p1776_p12, %p1775_p11 }
  0x1b   : > { %p1778_p0 = pneg %p1777_p13 }
  0x1d   : > { %p1783_p5 = pnand %p1781_p3, %p1778_p0 }
  0x1f   : > { %1786 = shalt.err (!%p1783_p5)
}
  0x20   : > { %s1787_s9 = scalar_lea.vmem %s171_s26, 2048  ;;  %p1795_p1 = scmp.lt.s32.totalorder %s171_s26, %s171_s26 }
  0x21   : > { %p1788_p7 = scmp.ne.s32.totalorder %s171_s26, %s1787_s9  ;;  %p1796_p4 = scmp.lt.s32.totalorder %s1787_s9, %s1787_s9 }
  0x23   : > { %p1790_p9 = pnand %p1788_p7, %p1776_p12  ;;  %p1797_p8 = por %p1796_p4, %p1795_p1 }
  0x25   : > { %p1791_p6 = pneg %p1790_p9 }
  0x27   : > { %p1798_p2 = pnand %p1797_p8, %p1791_p6 }
  0x29   : > { %1801 = shalt.err (!%p1798_p2)
}
  0x2a   : > { %s1921_s10 = smov 64   ;;  %s1922_s11 = smov 4  }
  0x2b   : > { %1642 = dma.hbm_to_vmem [thread:$0]  (!%p2011_p10), %s2258_s1, 2048, %s171_s26, [#allocation7], %s1921_s10, %s1921_s10, %s1922_s11  }
  0x2c   : > { %p41_p1 = scmp.ge.s32.totalorder %s39_s28, 8  ;;  %s48_s25 = sadd.s32 1, %s1906_s14 }
  0x2d   : > { %p55_p2 = scmp.ne.s32.totalorder %s1906_s14, %s1902_s13  ;;  %p56_p4 = scmp.eq.s32.totalorder %s1918_s17, 0 }
  0x2e   : > { %s2285_s28 = smov (%p41_p1, %s39_s28), 0  ;;  %p2272_p8 = scmp.ne.s32.totalorder %s2266_s21, 0 }
  0x2f   : > { %p2038_p6 = por %p56_p4, %p55_p2  ;;  %s43_s27 = ssub.s32 %s1914_s16, %s2285_s28 }
  0x30   : > { %p2044_p11 = por %p2272_p8, %p55_p2  ;;  %p1652_p12 = scmp.lt.s32.totalorder %s1918_s17, 8 }
  0x31   : > { %p46_p10 = scmp.eq.s32.totalorder %s43_s27, 0  ;;  %s190_s26 = sand.u32 1, %s1906_s14  }
  0x32   : > { %s1279_s4 = sshll.u32 %s190_s26, 8  ;;  %s1374_s6 = sshll.u32 %s1914_s16, 12 }
  0x33   : > { %s2053_s5 = scalar_select %p46_p10, %s1906_s14, %s48_s25  }
  0x34   : > { %s2059_s9 = scalar_lea.hbm %s2257_s0, %s1374_s6  ;;  %s194_s21 = scalar_lea.vmem [#allocation3], %s1279_s4 }
  0x35   : > { %s204_s10 = sshll.u32 %s194_s21, 4  ;;  %p2065_p13 = pnand %p1652_p12, %p2038_p6  ;;  %s2061_s10 = int_to_ptr.vmem [resolvable:$true] %s204_s10 }
  0x36   : > { %s2069_s18 = scalar_lea.sflag [#allocation4], %s190_s26  ;;  %s1802_s19 = scalar_lea.hbm %s2059_s9, 4096 }
  0x37   : > { %p1803_p0 = scmp.ne.s32.totalorder %s2059_s9, %s1802_s19  ;;  %p1804_p3 = pneg %p2065_p13 }
  0x38   : > { %s1807_s29 = scalar_lea.hbm %s2257_s0, 32768  ;;  %p1808_p9 = scmp.lt.u32.totalorder %s2059_s9, %s2257_s0 }
  0x39   : > { %p1805_p5 = pnand %p1804_p3, %p1803_p0  ;;  %p1809_p1 = scmp.lt.u32.totalorder %s1807_s29, %s1802_s19 }
  0x3a   : > { %p1811_p4 = scmp.lt.u32.totalorder %s1802_s19, %s2059_s9 }
  0x3b   : > { %p1806_p7 = pneg %p1805_p5  ;;  %p1810_p2 = por %p1809_p1, %p1808_p9 }
  0x3d   : > { %p1812_p6 = por %p1811_p4, %p1810_p2 }
  0x3f   : > { %p1813_p8 = pnand %p1812_p6, %p1806_p7 }
  0x41   : > { %1816 = shalt.err (!%p1813_p8)
}
  0x42   : > { %s1817_s26 = scalar_lea.vmem %s2061_s10, 4096  ;;  %s1923_s7 = smov [#allocation3]  }
  0x43   : > { %p1818_p12 = scmp.ne.s32.totalorder %s2061_s10, %s1817_s26  ;;  %s1822_s8 = sshll.u32 %s1923_s7, 4  ;;  %s1823_s8 = int_to_ptr.vmem [resolvable:$false] %s1822_s8 }
  0x44   : > { %s1824_s21 = scalar_lea.vmem %s1823_s8, 8192  ;;  %p1825_p5 = scmp.lt.s32.totalorder %s2061_s10, %s1823_s8 }
  0x45   : > { %p1820_p10 = pnand %p1818_p12, %p1804_p3  ;;  %p1826_p9 = scmp.lt.s32.totalorder %s1824_s21, %s1817_s26 }
  0x47   : > { %p1821_p0 = pneg %p1820_p10  ;;  %p1827_p1 = por %p1826_p9, %p1825_p5 }
  0x49   : > { %p1828_p2 = pnand %p1827_p1, %p1821_p0 }
  0x4b   : > { %1831 = shalt.err (!%p1828_p2)
}
  0x4c   : > { %s1924_s19 = smov 128   ;;  %s1925_s25 = smov 8  }
  0x4d   : > { %1646 = dma.hbm_to_vmem [thread:$0]  (!%p2065_p13), %s2059_s9, 4096, %s2061_s10, %s2069_s18, %s1924_s19, %s1924_s19, %s1925_s25  }
  0x4e   : > { %p2275_p3 = scmp.ne.s32.totalorder %s2269_s24, 0 }
  0x4f   : > { %s2100_s27 = sand.u32 (!%p2275_p3), 1, %s1902_s13   ;;  %p2276_p7 = scmp.ne.s32.totalorder (!%p2275_p3), %s2267_s22, 0 }
  0x50   : > { %216 = sbr.rel (%p2275_p3) target bundleno = 419 (0x1a3), region = 32  ;;  %s1284_s29 = sshll.u32 (!%p2275_p3), %s2100_s27, 8 }
  0x51   : > { %s219_s4 = scalar_lea.sflag (!%p2275_p3), [#allocation4], %s2100_s27  ;;  %s2104_s6 = scalar_lea.vmem (!%p2275_p3), [#allocation3], %s1284_s29 }
  0x57   : > { %1885 = dma.done.wait (%p2276_p7), %s219_s4, 4096  }
  0x58   : > { %1887 = vsyncadd (%p2276_p7), %s219_s4, 4294963200  ;;  %p2277_p13 = scmp.ne.s32.totalorder %s2265_s20, 0 }
  0x5a   : > { %1889 = dma.done.wait (%p2277_p13), [#allocation7], 2048  }
  0x5b   : > { %1891 = vsyncadd (%p2277_p13), [#allocation7], 4294965248  ;;  %v1710_v0 = vld [vmem:[#allocation6 + $0x40] sm:$0xff]   ;;  %v1712_v2 = vld [vmem:[#allocation6 + $0x48] sm:$0xff]   ;;  %s1286_s24 = sshll.u32 %s2100_s27, 7  ;;  %s1407_s10 = sshll.u32 %s1910_s15, 11 }
  0x5c   : > { %v1711_v1 = vld [vmem:[#allocation6] sm:$0xff]   ;;  %1503 = vmatprep.subr.bf16.mxu0 %v1710_v0  ;;  %1615 = vmatprep.subr.bf16.mxu1 %v1710_v0  ;;  %v1713_v3 = vld [vmem:[#allocation6 + $0x8] sm:$0xff]   ;;  %v1714_v4 = vld [vmem:[#allocation6 + $0x50] sm:$0xff]   ;;  %s2156_s9 = scalar_lea.vmem [#allocation8], %s1286_s24  ;;  %s2205_s7 = scalar_lea.hbm %s2260_s3, %s1407_s10 }
  0x5d   : > { %1504 = vmatpush3.bf16.msra.mxu0 %v1711_v1  ;;  %1623 = vmatpush3.bf16.msra.mxu1 %v1711_v1  ;;  %v1715_v5 = vld [vmem:[#allocation6 + $0x10] sm:$0xff]   ;;  %v1716_v6 = vld [vmem:[#allocation6 + $0x58] sm:$0xff]   ;;  %v1718_v8 = vld [vmem:[#allocation6 + $0x60] sm:$0xff]   ;;  %s1158_s11 = sshll.u32 %s2156_s9, 4  ;;  %s1144_s15 = scalar_lea.sflag [#allocation5], %s2100_s27  ;;  %s2207_s11 = int_to_ptr.vmem [resolvable:$true] %s1158_s11 }
  0x5e   : > { %1505 = vmatprep.subr.bf16.mxu0 %v1712_v2  ;;  %1616 = vmatprep.subr.bf16.mxu1 %v1712_v2  ;;  %v1717_v7 = vld [vmem:[#allocation6 + $0x18] sm:$0xff]   ;;  %v1719_v9 = vld [vmem:[#allocation6 + $0x20] sm:$0xff]   ;;  %v1720_v10 = vld [vmem:[#allocation6 + $0x68] sm:$0xff]   ;;  %s1832_s8 = scalar_lea.vmem %s2207_s11, 2048  ;;  %s1926_s21 = smov [#allocation8]  }
  0x5f   : > { %v1728_v11 = vld [vmem:[%s2104_s6 + $0x4] ss:$8 sps:$4 sm:$0xff]   ;;  %v1722_v14 = vld [vmem:[#allocation6 + $0x70] sm:$0xff]   ;;  %v1724_v16 = vld [vmem:[#allocation6 + $0x78] sm:$0xff]   ;;  %p1833_p4 = scmp.ne.s32.totalorder %s2207_s11, %s1832_s8  ;;  %s1836_s19 = sshll.u32 %s1926_s21, 4  ;;  %s1837_s19 = int_to_ptr.vmem [resolvable:$false] %s1836_s19 }
  0x60   : > { %v1731_v12 = vld [vmem:[%s2104_s6 + $0x84] ss:$8 sps:$4 sm:$0xff]   ;;  %612 = vmatprep.mubr.bf16.mxu0 %v1728_v11  ;;  %v1723_v15 = vld [vmem:[#allocation6 + $0x30] sm:$0xff]   ;;  %v1725_v17 = vld [vmem:[#allocation6 + $0x38] sm:$0xff]   ;;  %s1838_s25 = scalar_lea.vmem %s1837_s19, 4096  ;;  %p1839_p12 = scmp.lt.s32.totalorder %s2207_s11, %s1837_s19 }
  0x61   : > { %1506 = vmatpush3.bf16.msra.mxu0 %v1713_v3  ;;  %1624 = vmatpush3.bf16.msra.mxu1 %v1713_v3  ;;  %v1721_v13 = vld [vmem:[#allocation6 + $0x28] sm:$0xff]   ;;  %v1732_v20 = vld [vmem:[%s2104_s6 + $0x14] ss:$8 sps:$4 sm:$0xff]   ;;  %v1736_v22 = vld [vmem:[%s2104_s6 + $0x10] ss:$8 sps:$4 sm:$0xff]   ;;  %p1834_p6 = pnand %p1833_p4, %p2044_p11  ;;  %p1840_p10 = scmp.lt.s32.totalorder %s1838_s25, %s1832_s8 }
  0x62   : > { %1507 = vmatprep.subr.bf16.mxu0 %v1714_v4  ;;  %1617 = vmatprep.subr.bf16.mxu1 %v1714_v4  ;;  %v1726_v18 = vld [vmem:[%s2104_s6] ss:$8 sps:$4 sm:$0xff]   ;;  %v1734_v21 = vld [vmem:[%s2104_s6 + $0x94] ss:$8 sps:$4 sm:$0xff]   ;;  %v1737_v23 = vld [vmem:[%s2104_s6 + $0x90] ss:$8 sps:$4 sm:$0xff]  }
  0x63   : > { %676 = vmatprep.mubr.bf16.mxu1 %v1731_v12  ;;  %v1729_v19 = vld [vmem:[%s2104_s6 + $0x80] ss:$8 sps:$4 sm:$0xff]   ;;  %v1738_v24 = vld [vmem:[%s2104_s6 + $0x24] ss:$8 sps:$4 sm:$0xff]   ;;  %v1744_v28 = vld [vmem:[%s2104_s6 + $0x34] ss:$8 sps:$4 sm:$0xff]   ;;  %p1835_p8 = pneg %p1834_p6  ;;  %p1841_p0 = por %p1840_p10, %p1839_p12 }
  0x64   : > { %v1740_v25 = vld [vmem:[%s2104_s6 + $0xa4] ss:$8 sps:$4 sm:$0xff]   ;;  %v1742_v26 = vld [vmem:[%s2104_s6 + $0x20] ss:$8 sps:$4 sm:$0xff]   ;;  %v1746_v29 = vld [vmem:[%s2104_s6 + $0xb4] ss:$8 sps:$4 sm:$0xff]  }
  0x65   : > { %1508 = vmatpush3.bf16.msra.mxu0 %v1715_v5  ;;  %1625 = vmatpush3.bf16.msra.mxu1 %v1715_v5  ;;  %v1743_v27 = vld [vmem:[%s2104_s6 + $0xa0] ss:$8 sps:$4 sm:$0xff]   ;;  %v1748_v30 = vld [vmem:[%s2104_s6 + $0x30] ss:$8 sps:$4 sm:$0xff]   ;;  %v1750_v32 = vld [vmem:[%s2104_s6 + $0x44] ss:$8 sps:$4 sm:$0xff]   ;;  %p1842_p5 = pnand %p1841_p0, %p1835_p8 }
  0x66   : > { %1509 = vmatprep.subr.bf16.mxu0 %v1716_v6  ;;  %1618 = vmatprep.subr.bf16.mxu1 %v1716_v6  ;;  %v1749_v31 = vld [vmem:[%s2104_s6 + $0xb0] ss:$8 sps:$4 sm:$0xff]   ;;  %v1752_v33 = vld [vmem:[%s2104_s6 + $0xc4] ss:$8 sps:$4 sm:$0xff]   ;;  %v1754_v34 = vld [vmem:[%s2104_s6 + $0x40] ss:$8 sps:$4 sm:$0xff]  }
  0x67   : > { %v1755_v35 = vld [vmem:[%s2104_s6 + $0xc0] ss:$8 sps:$4 sm:$0xff]   ;;  %v1756_v36 = vld [vmem:[%s2104_s6 + $0x54] ss:$8 sps:$4 sm:$0xff]   ;;  %v1760_v38 = vld [vmem:[%s2104_s6 + $0x50] ss:$8 sps:$4 sm:$0xff]  }
  0x68   : > { %v1758_v37 = vld [vmem:[%s2104_s6 + $0xd4] ss:$8 sps:$4 sm:$0xff]   ;;  %v1761_v39 = vld [vmem:[%s2104_s6 + $0xd0] ss:$8 sps:$4 sm:$0xff]   ;;  %v1762_v40 = vld [vmem:[%s2104_s6 + $0x64] ss:$8 sps:$4 sm:$0xff]  }
  0x69   : > { %1510 = vmatpush3.bf16.msra.mxu0 %v1717_v7  ;;  %1626 = vmatpush3.bf16.msra.mxu1 %v1717_v7  ;;  %v1764_v41 = vld [vmem:[%s2104_s6 + $0xe4] ss:$8 sps:$4 sm:$0xff]   ;;  %v1766_v42 = vld [vmem:[%s2104_s6 + $0x60] ss:$8 sps:$4 sm:$0xff]   ;;  %v1768_v44 = vld [vmem:[%s2104_s6 + $0x74] ss:$8 sps:$4 sm:$0xff]  }
  0x6a   : > { %1511 = vmatprep.subr.bf16.mxu0 %v1718_v8  ;;  %1619 = vmatprep.subr.bf16.mxu1 %v1718_v8  ;;  %v1767_v43 = vld [vmem:[%s2104_s6 + $0xe0] ss:$8 sps:$4 sm:$0xff]   ;;  %v1770_v45 = vld [vmem:[%s2104_s6 + $0xf4] ss:$8 sps:$4 sm:$0xff]   ;;  %v1772_v46 = vld [vmem:[%s2104_s6 + $0x70] ss:$8 sps:$4 sm:$0xff]  }
  0x6b   : > { %v1773_v47 = vld [vmem:[%s2104_s6 + $0xf0] ss:$8 sps:$4 sm:$0xff]   ;;  %v2149_v51 = vld [vmem:[%s2259_s2] ss:$0 sm:$0xff] }
  0x6d   : > { %1512 = vmatpush3.bf16.msra.mxu0 %v1719_v9  ;;  %1627 = vmatpush3.bf16.msra.mxu1 %v1719_v9 }
  0x6e   : > { %1513 = vmatprep.subr.bf16.mxu0 %v1720_v10  ;;  %1620 = vmatprep.subr.bf16.mxu1 %v1720_v10 }
  0x71   : > { %1514 = vmatpush3.bf16.msra.mxu0 %v1721_v13  ;;  %1628 = vmatpush3.bf16.msra.mxu1 %v1721_v13 }
  0x72   : > { %1515 = vmatprep.subr.bf16.mxu0 %v1722_v14  ;;  %1621 = vmatprep.subr.bf16.mxu1 %v1722_v14 }
  0x75   : > { %1516 = vmatpush3.bf16.msra.mxu0 %v1723_v15  ;;  %1629 = vmatpush3.bf16.msra.mxu1 %v1723_v15 }
  0x76   : > { %1517 = vmatprep.subr.bf16.mxu0 %v1724_v16  ;;  %1622 = vmatprep.subr.bf16.mxu1 %v1724_v16 }
  0x79   : > { %1518 = vmatpush3.bf16.msra.mxu0 %v1725_v17  ;;  %1630 = vmatpush3.bf16.msra.mxu1 %v1725_v17 }
  0x7c   : > { %613 = vmatmul.mubr.bf16.vlgmr.msra.gmra.mrb[0].mxu0 %v1726_v18  ;;  %677 = vmatmul.mubr.bf16.vlgmr.msra.gmra.mrb[0].mxu1 %v1729_v19 }
  0x7d   : > { %620 = vmatprep.mubr.bf16.mxu0 %v1732_v20  ;;  %684 = vmatprep.mubr.bf16.mxu1 %v1734_v21 }
  0x84   : > { %621 = vmatmul.mubr.bf16.gmra.mrb[4].mxu0 %v1736_v22  ;;  %685 = vmatmul.mubr.bf16.gmra.mrb[4].mxu1 %v1737_v23 }
  0x85   : > { %628 = vmatprep.mubr.bf16.mxu0 %v1738_v24  ;;  %692 = vmatprep.mubr.bf16.mxu1 %v1740_v25 }
  0x8c   : > { %629 = vmatmul.mubr.bf16.gmra.mrb[8].mxu0 %v1742_v26  ;;  %693 = vmatmul.mubr.bf16.gmra.mrb[8].mxu1 %v1743_v27 }
  0x8d   : > { %636 = vmatprep.mubr.bf16.mxu0 %v1744_v28  ;;  %700 = vmatprep.mubr.bf16.mxu1 %v1746_v29 }
  0x94   : > { %637 = vmatmul.mubr.bf16.gmra.mrb[12].mxu0 %v1748_v30  ;;  %701 = vmatmul.mubr.bf16.gmra.mrb[12].mxu1 %v1749_v31 }
  0x95   : > { %644 = vmatprep.mubr.bf16.mxu0 %v1750_v32  ;;  %708 = vmatprep.mubr.bf16.mxu1 %v1752_v33 }
  0x9c   : > { %645 = vmatmul.mubr.bf16.gmra.mrb[16].mxu0 %v1754_v34  ;;  %709 = vmatmul.mubr.bf16.gmra.mrb[16].mxu1 %v1755_v35 }
  0x9d   : > { %652 = vmatprep.mubr.bf16.mxu0 %v1756_v36  ;;  %716 = vmatprep.mubr.bf16.mxu1 %v1758_v37 }
  0xa4   : > { %653 = vmatmul.mubr.bf16.gmra.mrb[20].mxu0 %v1760_v38  ;;  %717 = vmatmul.mubr.bf16.gmra.mrb[20].mxu1 %v1761_v39 }
  0xa5   : > { %660 = vmatprep.mubr.bf16.mxu0 %v1762_v40  ;;  %724 = vmatprep.mubr.bf16.mxu1 %v1764_v41 }
  0xac   : > { %661 = vmatmul.mubr.bf16.gmra.mrb[24].mxu0 %v1766_v42  ;;  %725 = vmatmul.mubr.bf16.gmra.mrb[24].mxu1 %v1767_v43 }
  0xad   : > { %668 = vmatprep.mubr.bf16.mxu0 %v1768_v44  ;;  %732 = vmatprep.mubr.bf16.mxu1 %v1770_v45 }
  0xb4   : > { %669 = vmatmul.mubr.bf16.gmra.mrb[28].mxu0 %v1772_v46  ;;  %733 = vmatmul.mubr.bf16.gmra.mrb[28].mxu1 %v1773_v47 }
 0x14f   : > { %v1519_v48 = vpop.f32.mrb[0].mxu0  ;;  %v1567_v49 = vpop.f32.mrb[0].mxu1 }
 0x150   : > { %v1520_v50 = vpop.f32.mrb[1].mxu0  ;;  %v1568_v52 = vpop.f32.mrb[1].mxu1 }
 0x151   : > { %v1521_v53 = vadd.f32 %v1520_v50, %v1519_v48  ;;  %v1569_v54 = vadd.f32 %v1568_v52, %v1567_v49  ;;  %v1522_v55 = vpop.f32.mrb[2].mxu0  ;;  %v1570_v56 = vpop.f32.mrb[2].mxu1 }
 0x152   : > { %v1523_v57 = vpop.f32.mrb[3].mxu0  ;;  %v1571_v58 = vpop.f32.mrb[3].mxu1 }
 0x153   : > { %v919_v59 = vadd.f32 %v1521_v53, %v2149_v51  ;;  %v935_v60 = vadd.f32 %v1569_v54, %v2149_v51  ;;  %v1524_v61 = vadd.f32 %v1523_v57, %v1522_v55  ;;  %v1572_v62 = vadd.f32 %v1571_v58, %v1570_v56 }
 0x155   : > { %v920_v63 = vadd.f32 %v1524_v61, %v2149_v51  ;;  %v936_v0 = vadd.f32 %v1572_v62, %v2149_v51  ;;  %v951_v1 = vmax.f32 %v919_v59, 0.0  ;;  %v967_v2 = vmax.f32 %v935_v60, 0.0 }
 0x157   : > { %v952_v3 = vmax.f32 %v920_v63, 0.0  ;;  %v968_v4 = vmax.f32 %v936_v0, 0.0  ;;  %v1525_v5 = vpop.f32.mrb[4].mxu0  ;;  %v1573_v6 = vpop.f32.mrb[4].mxu1 }
 0x158   : > { %v1526_v7 = vpop.f32.mrb[5].mxu0  ;;  %v1574_v8 = vpop.f32.mrb[5].mxu1 }
 0x159   : > { %v1411_v9 = vpack.c.bf16 %v952_v3, %v951_v1  ;;  %v1451_v10 = vpack.c.bf16 %v968_v4, %v967_v2  ;;  %v1527_v11 = vadd.f32 %v1526_v7, %v1525_v5  ;;  %v1575_v12 = vadd.f32 %v1574_v8, %v1573_v6  ;;  %v1528_v13 = vpop.f32.mrb[6].mxu0  ;;  %v1576_v14 = vpop.f32.mrb[6].mxu1 }
 0x15a   : > { %v1529_v15 = vpop.f32.mrb[7].mxu0  ;;  %v1577_v16 = vpop.f32.mrb[7].mxu1 }
 0x15b   : > { %1412 = vst [vmem:[%s2156_s9] sm:$0xff] %v1411_v9   ;;  %1495 = vst [vmem:[%s2156_s9 + $0x40] sm:$0xff] %v1451_v10   ;;  %v921_v17 = vadd.f32 %v1527_v11, %v2149_v51  ;;  %v937_v18 = vadd.f32 %v1575_v12, %v2149_v51  ;;  %v1530_v19 = vadd.f32 %v1529_v15, %v1528_v13 }
 0x15c   : > { %v1578_v20 = vadd.f32 %v1577_v16, %v1576_v14 }
 0x15d   : > { %v922_v21 = vadd.f32 %v1530_v19, %v2149_v51  ;;  %v953_v23 = vmax.f32 %v921_v17, 0.0  ;;  %v969_v24 = vmax.f32 %v937_v18, 0.0 }
 0x15e   : > { %v938_v22 = vadd.f32 %v1578_v20, %v2149_v51 }
 0x15f   : > { %v954_v25 = vmax.f32 %v922_v21, 0.0  ;;  %v1531_v27 = vpop.f32.mrb[8].mxu0  ;;  %v1579_v28 = vpop.f32.mrb[8].mxu1 }
 0x160   : > { %v970_v26 = vmax.f32 %v938_v22, 0.0  ;;  %v1532_v29 = vpop.f32.mrb[9].mxu0  ;;  %v1580_v30 = vpop.f32.mrb[9].mxu1 }
 0x161   : > { %v1416_v31 = vpack.c.bf16 %v954_v25, %v953_v23  ;;  %v1533_v33 = vadd.f32 %v1532_v29, %v1531_v27  ;;  %v1581_v34 = vadd.f32 %v1580_v30, %v1579_v28  ;;  %v1534_v35 = vpop.f32.mrb[10].mxu0  ;;  %v1582_v36 = vpop.f32.mrb[10].mxu1 }
 0x162   : > { %v1456_v32 = vpack.c.bf16 %v970_v26, %v969_v24  ;;  %v1535_v37 = vpop.f32.mrb[11].mxu0  ;;  %v1583_v38 = vpop.f32.mrb[11].mxu1 }
 0x163   : > { %1488 = vst [vmem:[%s2156_s9 + $0x8] sm:$0xff] %v1416_v31   ;;  %v923_v39 = vadd.f32 %v1533_v33, %v2149_v51  ;;  %v939_v40 = vadd.f32 %v1581_v34, %v2149_v51  ;;  %v1536_v41 = vadd.f32 %v1535_v37, %v1534_v35  ;;  %v1584_v42 = vadd.f32 %v1583_v38, %v1582_v36 }
 0x164   : > { %1496 = vst [vmem:[%s2156_s9 + $0x48] sm:$0xff] %v1456_v32  }
 0x165   : > { %v924_v43 = vadd.f32 %v1536_v41, %v2149_v51  ;;  %v940_v44 = vadd.f32 %v1584_v42, %v2149_v51  ;;  %v955_v45 = vmax.f32 %v923_v39, 0.0  ;;  %v971_v46 = vmax.f32 %v939_v40, 0.0 }
 0x167   : > { %v956_v47 = vmax.f32 %v924_v43, 0.0  ;;  %v972_v48 = vmax.f32 %v940_v44, 0.0  ;;  %v1537_v49 = vpop.f32.mrb[12].mxu0  ;;  %v1585_v50 = vpop.f32.mrb[12].mxu1 }
 0x168   : > { %v1538_v52 = vpop.f32.mrb[13].mxu0  ;;  %v1586_v53 = vpop.f32.mrb[13].mxu1 }
 0x169   : > { %v1421_v54 = vpack.c.bf16 %v956_v47, %v955_v45  ;;  %v1461_v55 = vpack.c.bf16 %v972_v48, %v971_v46  ;;  %v1539_v56 = vadd.f32 %v1538_v52, %v1537_v49  ;;  %v1587_v57 = vadd.f32 %v1586_v53, %v1585_v50  ;;  %v1540_v58 = vpop.f32.mrb[14].mxu0  ;;  %v1588_v59 = vpop.f32.mrb[14].mxu1 }
 0x16a   : > { %v1541_v60 = vpop.f32.mrb[15].mxu0  ;;  %v1589_v61 = vpop.f32.mrb[15].mxu1 }
 0x16b   : > { %1489 = vst [vmem:[%s2156_s9 + $0x10] sm:$0xff] %v1421_v54   ;;  %1497 = vst [vmem:[%s2156_s9 + $0x50] sm:$0xff] %v1461_v55   ;;  %v925_v62 = vadd.f32 %v1539_v56, %v2149_v51  ;;  %v941_v63 = vadd.f32 %v1587_v57, %v2149_v51  ;;  %v1542_v0 = vadd.f32 %v1541_v60, %v1540_v58 }
 0x16c   : > { %v1590_v1 = vadd.f32 %v1589_v61, %v1588_v59 }
 0x16d   : > { %v926_v2 = vadd.f32 %v1542_v0, %v2149_v51  ;;  %v957_v4 = vmax.f32 %v925_v62, 0.0  ;;  %v973_v5 = vmax.f32 %v941_v63, 0.0 }
 0x16e   : > { %v942_v3 = vadd.f32 %v1590_v1, %v2149_v51 }
 0x16f   : > { %v958_v6 = vmax.f32 %v926_v2, 0.0  ;;  %v1543_v8 = vpop.f32.mrb[16].mxu0  ;;  %v1591_v9 = vpop.f32.mrb[16].mxu1 }
 0x170   : > { %v974_v7 = vmax.f32 %v942_v3, 0.0  ;;  %v1544_v10 = vpop.f32.mrb[17].mxu0  ;;  %v1592_v11 = vpop.f32.mrb[17].mxu1 }
 0x171   : > { %v1426_v12 = vpack.c.bf16 %v958_v6, %v957_v4  ;;  %v1545_v14 = vadd.f32 %v1544_v10, %v1543_v8  ;;  %v1593_v15 = vadd.f32 %v1592_v11, %v1591_v9  ;;  %v1546_v16 = vpop.f32.mrb[18].mxu0  ;;  %v1594_v17 = vpop.f32.mrb[18].mxu1 }
 0x172   : > { %v1466_v13 = vpack.c.bf16 %v974_v7, %v973_v5  ;;  %v1547_v18 = vpop.f32.mrb[19].mxu0  ;;  %v1595_v19 = vpop.f32.mrb[19].mxu1 }
 0x173   : > { %1490 = vst [vmem:[%s2156_s9 + $0x18] sm:$0xff] %v1426_v12   ;;  %v927_v20 = vadd.f32 %v1545_v14, %v2149_v51  ;;  %v943_v21 = vadd.f32 %v1593_v15, %v2149_v51  ;;  %v1548_v22 = vadd.f32 %v1547_v18, %v1546_v16  ;;  %v1596_v23 = vadd.f32 %v1595_v19, %v1594_v17 }
 0x174   : > { %1498 = vst [vmem:[%s2156_s9 + $0x58] sm:$0xff] %v1466_v13  }
 0x175   : > { %v928_v24 = vadd.f32 %v1548_v22, %v2149_v51  ;;  %v944_v25 = vadd.f32 %v1596_v23, %v2149_v51  ;;  %v959_v26 = vmax.f32 %v927_v20, 0.0  ;;  %v975_v27 = vmax.f32 %v943_v21, 0.0 }
 0x177   : > { %v960_v28 = vmax.f32 %v928_v24, 0.0  ;;  %v976_v29 = vmax.f32 %v944_v25, 0.0  ;;  %v1549_v30 = vpop.f32.mrb[20].mxu0  ;;  %v1597_v31 = vpop.f32.mrb[20].mxu1 }
 0x178   : > { %v1550_v32 = vpop.f32.mrb[21].mxu0  ;;  %v1598_v33 = vpop.f32.mrb[21].mxu1 }
 0x179   : > { %v1431_v34 = vpack.c.bf16 %v960_v28, %v959_v26  ;;  %v1471_v35 = vpack.c.bf16 %v976_v29, %v975_v27  ;;  %v1551_v36 = vadd.f32 %v1550_v32, %v1549_v30  ;;  %v1599_v37 = vadd.f32 %v1598_v33, %v1597_v31  ;;  %v1552_v38 = vpop.f32.mrb[22].mxu0  ;;  %v1600_v39 = vpop.f32.mrb[22].mxu1 }
 0x17a   : > { %v1553_v40 = vpop.f32.mrb[23].mxu0  ;;  %v1601_v41 = vpop.f32.mrb[23].mxu1 }
 0x17b   : > { %1491 = vst [vmem:[%s2156_s9 + $0x20] sm:$0xff] %v1431_v34   ;;  %1499 = vst [vmem:[%s2156_s9 + $0x60] sm:$0xff] %v1471_v35   ;;  %v929_v42 = vadd.f32 %v1551_v36, %v2149_v51  ;;  %v945_v43 = vadd.f32 %v1599_v37, %v2149_v51  ;;  %v1554_v44 = vadd.f32 %v1553_v40, %v1552_v38 }
 0x17c   : > { %v1602_v45 = vadd.f32 %v1601_v41, %v1600_v39 }
 0x17d   : > { %v930_v46 = vadd.f32 %v1554_v44, %v2149_v51  ;;  %v961_v48 = vmax.f32 %v929_v42, 0.0  ;;  %v977_v49 = vmax.f32 %v945_v43, 0.0 }
 0x17e   : > { %v946_v47 = vadd.f32 %v1602_v45, %v2149_v51 }
 0x17f   : > { %v962_v50 = vmax.f32 %v930_v46, 0.0  ;;  %v1555_v53 = vpop.f32.mrb[24].mxu0  ;;  %v1603_v54 = vpop.f32.mrb[24].mxu1 }
 0x180   : > { %v978_v52 = vmax.f32 %v946_v47, 0.0  ;;  %v1556_v55 = vpop.f32.mrb[25].mxu0  ;;  %v1604_v56 = vpop.f32.mrb[25].mxu1 }
 0x181   : > { %v1436_v57 = vpack.c.bf16 %v962_v50, %v961_v48  ;;  %v1557_v59 = vadd.f32 %v1556_v55, %v1555_v53  ;;  %v1605_v60 = vadd.f32 %v1604_v56, %v1603_v54  ;;  %v1558_v61 = vpop.f32.mrb[26].mxu0  ;;  %v1606_v62 = vpop.f32.mrb[26].mxu1 }
 0x182   : > { %v1476_v58 = vpack.c.bf16 %v978_v52, %v977_v49  ;;  %v1559_v63 = vpop.f32.mrb[27].mxu0  ;;  %v1607_v0 = vpop.f32.mrb[27].mxu1 }
 0x183   : > { %1492 = vst [vmem:[%s2156_s9 + $0x28] sm:$0xff] %v1436_v57   ;;  %v931_v1 = vadd.f32 %v1557_v59, %v2149_v51  ;;  %v947_v2 = vadd.f32 %v1605_v60, %v2149_v51  ;;  %v1560_v3 = vadd.f32 %v1559_v63, %v1558_v61  ;;  %v1608_v4 = vadd.f32 %v1607_v0, %v1606_v62 }
 0x184   : > { %1500 = vst [vmem:[%s2156_s9 + $0x68] sm:$0xff] %v1476_v58  }
 0x185   : > { %v932_v5 = vadd.f32 %v1560_v3, %v2149_v51  ;;  %v948_v6 = vadd.f32 %v1608_v4, %v2149_v51  ;;  %v963_v7 = vmax.f32 %v931_v1, 0.0  ;;  %v979_v8 = vmax.f32 %v947_v2, 0.0 }
 0x187   : > { %v964_v9 = vmax.f32 %v932_v5, 0.0  ;;  %v980_v10 = vmax.f32 %v948_v6, 0.0  ;;  %v1561_v11 = vpop.f32.mrb[28].mxu0  ;;  %v1609_v12 = vpop.f32.mrb[28].mxu1 }
 0x188   : > { %v1562_v13 = vpop.f32.mrb[29].mxu0  ;;  %v1610_v14 = vpop.f32.mrb[29].mxu1 }
 0x189   : > { %v1441_v15 = vpack.c.bf16 %v964_v9, %v963_v7  ;;  %v1481_v16 = vpack.c.bf16 %v980_v10, %v979_v8  ;;  %v1563_v17 = vadd.f32 %v1562_v13, %v1561_v11  ;;  %v1611_v18 = vadd.f32 %v1610_v14, %v1609_v12  ;;  %v1564_v19 = vpop.f32.mrb[30].mxu0  ;;  %v1612_v20 = vpop.f32.mrb[30].mxu1 }
 0x18a   : > { %v1565_v21 = vpop.f32.mrb[31].mxu0  ;;  %v1613_v22 = vpop.f32.mrb[31].mxu1 }
 0x18b   : > { %1493 = vst [vmem:[%s2156_s9 + $0x30] sm:$0xff] %v1441_v15   ;;  %1501 = vst [vmem:[%s2156_s9 + $0x70] sm:$0xff] %v1481_v16   ;;  %v933_v23 = vadd.f32 %v1563_v17, %v2149_v51  ;;  %v949_v24 = vadd.f32 %v1611_v18, %v2149_v51  ;;  %v1566_v25 = vadd.f32 %v1565_v21, %v1564_v19 }
 0x18c   : > { %v1614_v26 = vadd.f32 %v1613_v22, %v1612_v20 }
 0x18d   : > { %v934_v27 = vadd.f32 %v1566_v25, %v2149_v51  ;;  %v965_v29 = vmax.f32 %v933_v23, 0.0  ;;  %v981_v30 = vmax.f32 %v949_v24, 0.0 }
 0x18e   : > { %v950_v28 = vadd.f32 %v1614_v26, %v2149_v51 }
 0x18f   : > { %v966_v31 = vmax.f32 %v934_v27, 0.0 }
 0x190   : > { %v982_v32 = vmax.f32 %v950_v28, 0.0 }
 0x191   : > { %v1446_v33 = vpack.c.bf16 %v966_v31, %v965_v29 }
 0x192   : > { %v1486_v34 = vpack.c.bf16 %v982_v32, %v981_v30 }
 0x193   : > { %1494 = vst [vmem:[%s2156_s9 + $0x38] sm:$0xff] %v1446_v33  }
 0x194   : > { %1502 = vst [vmem:[%s2156_s9 + $0x78] sm:$0xff] %v1486_v34  }
 0x195   : > { %1845 = shalt.err (!%p1842_p5)
}
 0x196   : > { %s1846_s29 = scalar_lea.hbm %s2205_s7, 2048  ;;  %s1850_s20 = scalar_lea.hbm %s2260_s3, 16384 }
 0x197   : > { %p1847_p9 = scmp.ne.s32.totalorder %s2205_s7, %s1846_s29  ;;  %p1851_p3 = scmp.lt.u32.totalorder %s2205_s7, %s2260_s3 }
 0x198   : > { %p1852_p7 = scmp.lt.u32.totalorder %s1850_s20, %s1846_s29  ;;  %p1854_p4 = scmp.lt.u32.totalorder %s1846_s29, %s2205_s7 }
 0x199   : > { %p1848_p1 = pnand %p1847_p9, %p2044_p11 }
 0x19a   : > { %p1853_p13 = por %p1852_p7, %p1851_p3 }
 0x19b   : > { %p1849_p2 = pneg %p1848_p1 }
 0x19c   : > { %p1855_p6 = por %p1854_p4, %p1853_p13 }
 0x19e   : > { %p1856_p8 = pnand %p1855_p6, %p1849_p2 }
 0x1a0   : > { %1859 = shalt.err (!%p1856_p8)
}
 0x1a1   : > { %s1927_s9 = smov 64   ;;  %s1928_s10 = smov 4  }
 0x1a2   : > { %1637 = dma.vmem_to_hbm [thread:$0]  (%p2044_p11), %s2207_s11, 2048, %s2205_s7, %s1144_s15, %s1927_s9, %s1927_s9, %s1928_s10  }
 0x1a3 PF: > { %p1654_p12 = scmp.ge.s32.totalorder %s1918_s17, 2  ;;  %s1173_s18 = sand.u32 1, %s1898_s12  }
 0x1a4   : > { %p2278_p10 = scmp.ne.s32.totalorder %s2268_s23, 0  ;;  %s1174_s26 = scalar_lea.sflag [#allocation5], %s1173_s18 }
 0x1a6   : > { %p1648_p0 = pnand %p1654_p12, %p2278_p10 }
 0x1a8   : > { %1893 = dma.done.wait (!%p1648_p0), %s1174_s26, 2048  }
 0x1a9   : > { %1895 = vsyncadd (!%p1648_p0), %s1174_s26, 4294965248  ;;  %s20_s17 = sadd.s32 1, %s1918_s17   ;;  %s2279_s12 = smov %s1902_s13 }
 0x1aa   : > { %p17_p5 = scmp.ge.s32.totalorder %s20_s17, 10   ;;  %s2280_s13 = smov %s1906_s14 }
 0x1ab   : > { %s2281_s14 = smov %s2053_s5  ;;  %s2282_s15 = smov %s1914_s16 }
 0x1ac   : > { %s2283_s16 = smov %s2285_s28  ;;  %19 = sbr.rel (!%p17_p5) target bundleno = 7 (0x7), region = 97 }
 0x1b3   :  { %1179 = vsyncpa [#allocation4], 1 }
 0x1b4   :  { %1181 = vsyncpa [#allocation4 + $0x1], 1 }
 0x1b5   :  { %1182 = vsyncpa [#allocation7], 1 }
 0x1b6   :  { %1183 = vsyncpa [#allocation5], 1 }
 0x1b7   :  { %1185 = vsyncpa [#allocation5 + $0x1], 1 }

</bundles_post_ra>
